<compile_context>
chip_gen: v7x
topology: tpu7x:2x2x1
jax: 0.10.0
libtpu: 0.0.40
codegen_flags: <defaults>
</compile_context>

<pallas_src>
import jax
import jax.numpy as jnp
from jax.experimental import pallas as pl
from jax.experimental.pallas import tpu as pltpu

# SELU constants (match torch.nn.SELU)
_SELU_ALPHA = 1.6732632423543772
_SELU_SCALE = 1.0507009873554805


def _selu(x):
    return _SELU_SCALE * jnp.where(x > 0, x, _SELU_ALPHA * (jnp.exp(x) - 1.0))


def _relu6(x):
    return jnp.clip(x, 0.0, 6.0)


def _round_up(a, b):
    return (a + b - 1) // b * b


def _cdiv(a, b):
    return (a + b - 1) // b


def _dsm_kernel(x_ref,
                w1_ref, b1_ref,
                w2_ref, b2_ref,
                wh_ref, consts_ref,
                out_ref):
    x = x_ref[...]

    # embedding: Linear -> ReLU6 -> Linear -> ReLU6  (all f32 on the MXU/VPU)
    h = jnp.dot(x, w1_ref[...], preferred_element_type=jnp.float32) + b1_ref[...]
    h = _relu6(h)
    h = jnp.dot(h, w2_ref[...], preferred_element_type=jnp.float32) + b2_ref[...]
    xrep = _relu6(h)

    # Fused heads: columns are [shapeg | scaleg | gate (1/temp pre-folded) | pad].
    # consts rows: 0 = head bias, 1 = shape/scale offsets, 2 = SELU-column mask.
    bh = consts_ref[0:1, :]
    off = consts_ref[1:2, :]
    mask = consts_ref[2:3, :]
    head = jnp.dot(xrep, wh_ref[...], preferred_element_type=jnp.float32) + bh

    # shape/scale columns: SELU(head) + offset ; gate columns: head (temp folded).
    out_ref[...] = jnp.where(mask > 0.5, _selu(head) + off, head)


def dsm_forward(params, x, *, k, risks, temp, tile_n=8192, lane_pad_output=False):
    """Pallas implementation of DeepSurvivalMachinesTorch.forward.

    Returns a list of `risks` tuples (shape_i, scale_i, gate_i), each [N, k].
    """
    f32 = jnp.float32
    n, inputdim = x.shape
    kr = k * risks
    l0 = params["w1"].shape[1]
    l1 = params["w2"].shape[1]

    # Output width: compact (3*kr, full-array last dim -> legal BlockSpec, ~5x
    # less HBM writeback) or lane-dense padded-to-128 (unmasked vst) variant.
    if lane_pad_output:
        pw = max(128, _round_up(3 * kr, 128))
    else:
        pw = 3 * kr

    # --- fused head weights (1/temp folded into gate columns) ---------------
    inv_temp = 1.0 / float(temp)
    wh = jnp.concatenate(
        [params["wsh"].astype(f32),
         params["wsc"].astype(f32),
         params["wg"].astype(f32) * inv_temp], axis=1)            # (l1, 3*kr)
    # Packed resident constants: rows 0..2 = bias | offset | mask.
    row_bh = jnp.concatenate(
        [params["bsh"].astype(f32), params["bsc"].astype(f32),
         jnp.zeros((1, kr), f32)], axis=1)
    row_off = jnp.concatenate(
        [params["shape_p"].astype(f32), params["scale_p"].astype(f32),
         jnp.zeros((1, kr), f32)], axis=1)
    row_mask = jnp.concatenate(
        [jnp.ones((1, 2 * kr), f32), jnp.zeros((1, kr), f32)], axis=1)
    consts = jnp.concatenate(
        [row_bh, row_off, row_mask, jnp.zeros((5, 3 * kr), f32)], axis=0)  # (8, 3kr)
    if pw != 3 * kr:
        wh = jnp.pad(wh, ((0, 0), (0, pw - 3 * kr)))
        consts = jnp.pad(consts, ((0, 0), (0, pw - 3 * kr)))

    # --- batch tiling --------------------------------------------------------
    n8 = _round_up(n, 8)
    tn = _round_up(min(int(tile_n), n8), 8)
    # Prefer >= 2 grid steps when the batch allows it (v7x: 2 TCs share the
    # "parallel" grid axis; with grid=1 one core would sit idle).
    if n8 >= 16 and _cdiv(n8, tn) < 2:
        tn = _round_up(_cdiv(n8, 2), 8)
    n_pad = _round_up(n, tn)
    x_p = x.astype(f32)
    if n_pad != n:
        x_p = jnp.pad(x_p, ((0, n_pad - n), (0, 0)))
    grid = (n_pad // tn,)

    def resident(shape):
        return pl.BlockSpec(shape, lambda i: (0, 0))

    in_specs = [
        pl.BlockSpec((tn, inputdim), lambda i: (i, 0)),           # x (pipelined)
        resident((inputdim, l0)), resident((1, l0)),              # w1, b1
        resident((l0, l1)), resident((1, l1)),                    # w2, b2
        resident((l1, pw)), resident((8, pw)),                    # wh, consts
    ]
    out_specs = pl.BlockSpec((tn, pw), lambda i: (i, 0))

    flops = 2 * n_pad * (inputdim * l0 + l0 * l1 + l1 * pw)
    bytes_accessed = 4 * (n_pad * (inputdim + pw)
                          + inputdim * l0 + l0 * l1 + l1 * pw
                          + l0 + l1 + 8 * pw)
    cost = pl.CostEstimate(flops=flops,
                           transcendentals=n_pad * pw,
                           bytes_accessed=bytes_accessed)

    # Scoped-VMEM: x/out double-buffered + resident weights.  Only override the
    # limit if we exceed the smallest default (v5e: 16 MiB); cap well below the
    # v7x 64 MiB/TC physical size.
    vmem_need = 4 * (2 * tn * (inputdim + pw)
                     + inputdim * l0 + l0 * l1 + l1 * pw + l0 + l1 + 8 * pw)
    vmem_limit = None
    if vmem_need > 12 * 1024 * 1024:
        vmem_limit = min(56 * 1024 * 1024, int(vmem_need * 3 // 2) + (2 << 20))

    out = pl.pallas_call(
        _dsm_kernel,
        out_shape=jax.ShapeDtypeStruct((n_pad, pw), f32),
        grid=grid,
        in_specs=in_specs,
        out_specs=out_specs,
        compiler_params=pltpu.CompilerParams(
            dimension_semantics=("parallel",),
            vmem_limit_bytes=vmem_limit),
        cost_estimate=cost,
    )(x_p,
      params["w1"], params["b1"],
      params["w2"], params["b2"],
      wh, consts)

    # Single slice over the slab, then one reshape to (n, 3, risks, k).
    slab = out[:n, :3 * kr].reshape(n, 3, risks, k)
    outcomes = []
    for i in range(risks):
        outcomes.append((slab[:, 0, i, :], slab[:, 1, i, :], slab[:, 2, i, :]))
    return outcomes


def init_params(key, inputdim, layers, k, risks):
    """Deterministic synthetic parameter init (shapes match the nn.Module)."""
    kr = k * risks
    lastdim = layers[-1] if len(layers) > 0 else inputdim
    keys = jax.random.split(key, 8)

    def lin_w(kk, din, dout):
        # stored pre-transposed: [din, dout]
        return (jax.random.normal(kk, (din, dout), jnp.float32)
                / jnp.sqrt(jnp.float32(din)))

    params = {
        # embedding: Linear(inputdim, layers[0]) ; Linear(layers[0], layers[1])
        "w1": lin_w(keys[0], inputdim, layers[0]),
        "b1": jax.random.normal(keys[1], (1, layers[0]), jnp.float32) * 0.1,
        "w2": lin_w(keys[2], layers[0], layers[1]),
        "b2": jax.random.normal(keys[3], (1, layers[1]), jnp.float32) * 0.1,
        # gate: Linear(lastdim, k*risks, bias=False)
        "wg": lin_w(keys[4], lastdim, kr),
        # scaleg / shapeg: Linear(lastdim, k*risks, bias=True)
        "wsc": lin_w(keys[5], lastdim, kr),
        "bsc": jax.random.normal(keys[6], (1, kr), jnp.float32) * 0.1,
        "wsh": lin_w(keys[7], lastdim, kr),
        "bsh": jnp.full((1, kr), 0.05, jnp.float32),
        # nn.Parameter(-torch.ones(k*risks))
        "shape_p": -jnp.ones((1, kr), jnp.float32),
        "scale_p": -jnp.ones((1, kr), jnp.float32),
    }
    return params, lastdim


def reference_forward(params, x, *, k, risks, temp):
    """Pure-JAX reference for correctness checking (mirrors the torch module)."""
    h = _relu6(x @ params["w1"] + params["b1"])
    xrep = _relu6(h @ params["w2"] + params["b2"])
    shape = _selu(xrep @ params["wsh"] + params["bsh"]) + params["shape_p"]
    scale = _selu(xrep @ params["wsc"] + params["bsc"]) + params["scale_p"]
    gate = (xrep @ params["wg"]) / float(temp)
    out = []
    for i in range(risks):
        out.append((shape[:, i * k:(i + 1) * k],
                    scale[:, i * k:(i + 1) * k],
                    gate[:, i * k:(i + 1) * k]))
    return out


def _check(outcomes, ref, n, k):
    for (s_k, sc_k, g_k), (s_r, sc_r, g_r) in zip(outcomes, ref):
        assert s_k.shape == (n, k) and sc_k.shape == (n, k) and g_k.shape == (n, k)
        assert jnp.allclose(s_k, s_r, atol=1e-5, rtol=1e-5)
        assert jnp.allclose(sc_k, sc_r, atol=1e-5, rtol=1e-5)
        assert jnp.allclose(g_k, g_r, atol=1e-6, rtol=1e-5)


if __name__ == "__main__":
    # Small config consistent with the module's constructor.
    # TODO(synk): kernel is specialized to len(layers) == 2; the layers==[] /
    # arbitrary-depth embedding path is not generated.
    inputdim = 16
    layers = [32, 32]
    k = 4
    risks = 2
    temp = 1000.0
    batch = 8

    key = jax.random.PRNGKey(0)
    k_x, k_p, k_x2 = jax.random.split(key, 3)
    x = jax.random.normal(k_x, (batch, inputdim), jnp.float32)
    params, _ = init_params(k_p, inputdim, layers, k, risks)
    ref_small = reference_forward(params, x, k=k, risks=risks, temp=temp)

    # Single-tile path, compact (unpadded) output layout.
    outcomes = dsm_forward(params, x, k=k, risks=risks, temp=temp)
    outcomes = jax.block_until_ready(outcomes)
    _check(outcomes, ref_small, batch, k)

    # Lane-dense padded output layout (benchmark variant) — same results.
    outcomes_pad = dsm_forward(params, x, k=k, risks=risks, temp=temp,
                               lane_pad_output=True)
    outcomes_pad = jax.block_until_ready(outcomes_pad)
    _check(outcomes_pad, ref_small, batch, k)

    # Multi-step pipelined grid path (batch not a multiple of the tile, and a
    # tile_n that is not a multiple of 8 to exercise the rounding logic).
    batch2 = 300
    x2 = jax.random.normal(k_x2, (batch2, inputdim), jnp.float32)
    outcomes2 = dsm_forward(params, x2, k=k, risks=risks, temp=temp, tile_n=100)
    outcomes2 = jax.block_until_ready(outcomes2)
    _check(outcomes2, reference_forward(params, x2, k=k, risks=risks, temp=temp),
           batch2, k)

    print("KERNEL_OK")
</pallas_src>

<mosaic_0001>
module attributes {stable_mosaic.version = 11 : i64} {
  func.func @_dsm_kernel(%arg0: i32, %arg1: memref<8x16xf32, #tpu.memory_space<vmem>>, %arg2: memref<16x32xf32, #tpu.memory_space<vmem>>, %arg3: memref<1x32xf32, #tpu.memory_space<vmem>>, %arg4: memref<32x32xf32, #tpu.memory_space<vmem>>, %arg5: memref<1x32xf32, #tpu.memory_space<vmem>>, %arg6: memref<32x24xf32, #tpu.memory_space<vmem>>, %arg7: memref<8x24xf32, #tpu.memory_space<vmem>>, %arg8: memref<8x24xf32, #tpu.memory_space<vmem>>) attributes {dimension_semantics = [#tpu.dimension_semantics<parallel>], iteration_bounds = array<i64: 1>, scalar_prefetch = 0 : i64, scratch_operands = 0 : i64, tpu.core_type = #tpu.core_type<tc>, window_params = [{transform_indices = @transform_0, window_bounds = array<i64: 8, 16>}, {pipeline_mode = #tpu.pipeline_mode<synchronous>, transform_indices = @transform_1, window_bounds = array<i64: 16, 32>}, {pipeline_mode = #tpu.pipeline_mode<synchronous>, transform_indices = @transform_2, window_bounds = array<i64: 1, 32>}, {pipeline_mode = #tpu.pipeline_mode<synchronous>, transform_indices = @transform_3, window_bounds = array<i64: 32, 32>}, {pipeline_mode = #tpu.pipeline_mode<synchronous>, transform_indices = @transform_4, window_bounds = array<i64: 1, 32>}, {pipeline_mode = #tpu.pipeline_mode<synchronous>, transform_indices = @transform_5, window_bounds = array<i64: 32, 24>}, {pipeline_mode = #tpu.pipeline_mode<synchronous>, transform_indices = @transform_6, window_bounds = array<i64: 8, 24>}, {transform_indices = @transform_7, window_bounds = array<i64: 8, 24>}]} {
    %c0 = arith.constant 0 : index
    %c0_0 = arith.constant 0 : index
    %0 = vector.load %arg1[%c0, %c0_0] : memref<8x16xf32, #tpu.memory_space<vmem>>, vector<8x16xf32>
    %c0_1 = arith.constant 0 : index
    %c0_2 = arith.constant 0 : index
    %1 = vector.load %arg2[%c0_1, %c0_2] : memref<16x32xf32, #tpu.memory_space<vmem>>, vector<16x32xf32>
    %cst = arith.constant dense<0.000000e+00> : vector<8x32xf32>
    %2 = tpu.matmul %0, %1, %cst {dimension_numbers = #tpu.dot_dimension_numbers<[1], [0], [0], [1], [0, 0, 1, 1], [], []>} : vector<8x16xf32>, vector<16x32xf32>, vector<8x32xf32> -> vector<8x32xf32>
    %c0_3 = arith.constant 0 : index
    %c0_4 = arith.constant 0 : index
    %3 = vector.load %arg3[%c0_3, %c0_4] : memref<1x32xf32, #tpu.memory_space<vmem>>, vector<1x32xf32>
    %4 = vector.broadcast %3 : vector<1x32xf32> to vector<8x32xf32>
    %5 = arith.addf %2, %4 : vector<8x32xf32>
    %cst_5 = arith.constant 0.000000e+00 : f32
    %cst_6 = arith.constant 6.000000e+00 : f32
    %6 = vector.broadcast %cst_5 : f32 to vector<8x32xf32>
    %7 = arith.maximumf %6, %5 : vector<8x32xf32>
    %8 = vector.broadcast %cst_6 : f32 to vector<8x32xf32>
    %9 = arith.minimumf %8, %7 : vector<8x32xf32>
    %c0_7 = arith.constant 0 : index
    %c0_8 = arith.constant 0 : index
    %10 = vector.load %arg4[%c0_7, %c0_8] : memref<32x32xf32, #tpu.memory_space<vmem>>, vector<32x32xf32>
    %cst_9 = arith.constant dense<0.000000e+00> : vector<8x32xf32>
    %11 = tpu.matmul %9, %10, %cst_9 {dimension_numbers = #tpu.dot_dimension_numbers<[1], [0], [0], [1], [0, 0, 1, 1], [], []>} : vector<8x32xf32>, vector<32x32xf32>, vector<8x32xf32> -> vector<8x32xf32>
    %c0_10 = arith.constant 0 : index
    %c0_11 = arith.constant 0 : index
    %12 = vector.load %arg5[%c0_10, %c0_11] : memref<1x32xf32, #tpu.memory_space<vmem>>, vector<1x32xf32>
    %13 = vector.broadcast %12 : vector<1x32xf32> to vector<8x32xf32>
    %14 = arith.addf %11, %13 : vector<8x32xf32>
    %cst_12 = arith.constant 0.000000e+00 : f32
    %cst_13 = arith.constant 6.000000e+00 : f32
    %15 = vector.broadcast %cst_12 : f32 to vector<8x32xf32>
    %16 = arith.maximumf %15, %14 : vector<8x32xf32>
    %17 = vector.broadcast %cst_13 : f32 to vector<8x32xf32>
    %18 = arith.minimumf %17, %16 : vector<8x32xf32>
    %c0_14 = arith.constant 0 : index
    %c0_15 = arith.constant 0 : index
    %19 = vector.load %arg7[%c0_14, %c0_15] : memref<8x24xf32, #tpu.memory_space<vmem>>, vector<1x24xf32>
    %c1 = arith.constant 1 : index
    %c0_16 = arith.constant 0 : index
    %20 = vector.load %arg7[%c1, %c0_16] : memref<8x24xf32, #tpu.memory_space<vmem>>, vector<1x24xf32>
    %c2 = arith.constant 2 : index
    %c0_17 = arith.constant 0 : index
    %21 = vector.load %arg7[%c2, %c0_17] : memref<8x24xf32, #tpu.memory_space<vmem>>, vector<1x24xf32>
    %c0_18 = arith.constant 0 : index
    %c0_19 = arith.constant 0 : index
    %22 = vector.load %arg6[%c0_18, %c0_19] : memref<32x24xf32, #tpu.memory_space<vmem>>, vector<32x24xf32>
    %cst_20 = arith.constant dense<0.000000e+00> : vector<8x24xf32>
    %23 = tpu.matmul %18, %22, %cst_20 {dimension_numbers = #tpu.dot_dimension_numbers<[1], [0], [0], [1], [0, 0, 1, 1], [], []>} : vector<8x32xf32>, vector<32x24xf32>, vector<8x24xf32> -> vector<8x24xf32>
    %24 = vector.broadcast %19 : vector<1x24xf32> to vector<8x24xf32>
    %25 = arith.addf %23, %24 : vector<8x24xf32>
    %cst_21 = arith.constant 5.000000e-01 : f32
    %26 = vector.broadcast %cst_21 : f32 to vector<1x24xf32>
    %27 = arith.cmpf ogt, %21, %26 : vector<1x24xf32>
    %cst_22 = arith.constant 0.000000e+00 : f32
    %28 = vector.broadcast %cst_22 : f32 to vector<8x24xf32>
    %29 = arith.cmpf ogt, %25, %28 : vector<8x24xf32>
    %30 = math.exp %25 : vector<8x24xf32>
    %cst_23 = arith.constant 1.000000e+00 : f32
    %31 = vector.broadcast %cst_23 : f32 to vector<8x24xf32>
    %32 = arith.subf %30, %31 : vector<8x24xf32>
    %cst_24 = arith.constant 1.67326319 : f32
    %33 = vector.broadcast %cst_24 : f32 to vector<8x24xf32>
    %34 = arith.mulf %33, %32 : vector<8x24xf32>
    %35 = arith.select %29, %25, %34 : vector<8x24xi1>, vector<8x24xf32>
    %cst_25 = arith.constant 1.05070102 : f32
    %36 = vector.broadcast %cst_25 : f32 to vector<8x24xf32>
    %37 = arith.mulf %36, %35 : vector<8x24xf32>
    %38 = vector.broadcast %20 : vector<1x24xf32> to vector<8x24xf32>
    %39 = arith.addf %37, %38 : vector<8x24xf32>
    %40 = vector.shape_cast %27 : vector<1x24xi1> to vector<1x24xi1>
    %41 = vector.broadcast %40 : vector<1x24xi1> to vector<8x24xi1>
    %42 = arith.select %41, %39, %25 : vector<8x24xi1>, vector<8x24xf32>
    %c0_26 = arith.constant 0 : index
    %c0_27 = arith.constant 0 : index
    %43 = vector.load %arg8[%c0_26, %c0_27] : memref<8x24xf32, #tpu.memory_space<vmem>>, vector<8x24xf32>
    tpu.vector_store %arg8[%c0_26, %c0_27], %42 {strides = array<i32>} : memref<8x24xf32, #tpu.memory_space<vmem>>, vector<8x24xf32>,
    return
  }
  func.func @transform_0(%arg0: i32) -> (i32, i32) {
    %c0_i32 = arith.constant 0 : i32
    %c0_i32_0 = arith.constant 0 : i32
    return %arg0, %c0_i32 : i32, i32
  }
  func.func @transform_1(%arg0: i32) -> (i32, i32) {
    %c0_i32 = arith.constant 0 : i32
    %c0_i32_0 = arith.constant 0 : i32
    %c0_i32_1 = arith.constant 0 : i32
    return %c0_i32, %c0_i32_0 : i32, i32
  }
  func.func @transform_2(%arg0: i32) -> (i32, i32) {
    %c0_i32 = arith.constant 0 : i32
    %c0_i32_0 = arith.constant 0 : i32
    %c0_i32_1 = arith.constant 0 : i32
    return %c0_i32, %c0_i32_0 : i32, i32
  }
  func.func @transform_3(%arg0: i32) -> (i32, i32) {
    %c0_i32 = arith.constant 0 : i32
    %c0_i32_0 = arith.constant 0 : i32
    %c0_i32_1 = arith.constant 0 : i32
    return %c0_i32, %c0_i32_0 : i32, i32
  }
  func.func @transform_4(%arg0: i32) -> (i32, i32) {
    %c0_i32 = arith.constant 0 : i32
    %c0_i32_0 = arith.constant 0 : i32
    %c0_i32_1 = arith.constant 0 : i32
    return %c0_i32, %c0_i32_0 : i32, i32
  }
  func.func @transform_5(%arg0: i32) -> (i32, i32) {
    %c0_i32 = arith.constant 0 : i32
    %c0_i32_0 = arith.constant 0 : i32
    %c0_i32_1 = arith.constant 0 : i32
    return %c0_i32, %c0_i32_0 : i32, i32
  }
  func.func @transform_6(%arg0: i32) -> (i32, i32) {
    %c0_i32 = arith.constant 0 : i32
    %c0_i32_0 = arith.constant 0 : i32
    %c0_i32_1 = arith.constant 0 : i32
    return %c0_i32, %c0_i32_0 : i32, i32
  }
  func.func @transform_7(%arg0: i32) -> (i32, i32) {
    %c0_i32 = arith.constant 0 : i32
    %c0_i32_0 = arith.constant 0 : i32
    return %arg0, %c0_i32 : i32, i32
  }
}

</mosaic_0001>

<bundles_post_ra>
// kernel: tpu_custom_call.1
= control target key start
LH: loop header
LB: loop body
LE: loop exit
PB: predicated region body
PF: predicated region fallthrough
CT: control target
= control target key end

     0   :  { %v416_v2 = vmov 0.0|0.0   ;;  %vm417_vm0 = vmmov 0   ;;  %v418_v4 = vmov 0.0   ;;  %s523_s0 = inlined_call_operand.vmem [shape: f32[8,16], index: 0, kind: input, shape index: {}]   ;;  %s524_s1 = inlined_call_operand.vmem [shape: f32[16,32], index: 1, kind: input, shape index: {}]   ;;  %s525_s2 = inlined_call_operand.vmem [shape: f32[1,32], index: 2, kind: input, shape index: {}]   ;;  %s526_s3 = inlined_call_operand.vmem [shape: f32[32,32], index: 3, kind: input, shape index: {}]   ;;  %s527_s4 = inlined_call_operand.vmem [shape: f32[1,32], index: 4, kind: input, shape index: {}]   ;;  %s528_s5 = inlined_call_operand.vmem [shape: f32[32,24], index: 5, kind: input, shape index: {}]   ;;  %s529_s6 = inlined_call_operand.vmem [shape: f32[8,24], index: 6, kind: input, shape index: {}]   ;;  %s530_s7 = inlined_call_operand.hbm [shape: f32[8,24], index: 7, kind: output, shape index: {}]  }
   0x1   :  { %v28_v0 = vld [vmem:[%s524_s1] sm:$0xff]  ;;  %v29_v1 = vld [vmem:[%s524_s1 + $0x8] sm:$0xff]  ;;  %370 = vmatprep.subr.bf16.mxu0 %v416_v2  ;;  %345 = vmatprep.mubr.msk.f32.mxu0 %vm417_vm0, %v418_v4 }
   0x2   :  { %v371_v3 = vpack.c.bf16 %v29_v1, %v28_v0 }
   0x3   :  { %12 = vsyncpa [#allocation3], 0  ;;  %373 = vmatprep.subr.bf16.mxu1 %v416_v2  ;;  %356 = vmatprep.mubr.msk.f32.mxu1 %vm417_vm0, %v418_v4  ;;  %v27_v5 = vld [vmem:[%s523_s0] sm:$0xff]  ;;  %vm37_vm1 = vcmask 130048   ;;  %v114_v7 = vld [vmem:[%s526_s3 + $0x8] sm:$0xff]  ;;  %vm124_vm2 = vcmask 261120   ;;  %v298_v35 = vlaneseq }
   0x4   :  { %372 = vmatpush3.bf16.msra.mxu0 %v371_v3  ;;  %v113_v6 = vld [vmem:[%s526_s3] sm:$0xff]  ;;  %v115_v9 = vld [vmem:[%s526_s3 + $0x10] sm:$0xff]  ;;  %v116_v10 = vld [vmem:[%s526_s3 + $0x18] sm:$0xff]  ;;  %v419_v40 = vmov 0   ;;  %s420_s27 = smov [#allocation2]   ;;  %vm304_vm6 = vcmask 195584  }
   0x5   :  { %379 = vmatprep.subr.bf16.mxu0 %v416_v2  ;;  %v374_v8 = vpack.c.bf16 %v114_v7, %v113_v6  ;;  %v377_v11 = vpack.c.bf16 %v116_v10, %v115_v9  ;;  %v320_v12 = vld [vmem:[%s525_s2] ss:$0 sm:$0xff]  ;;  %v204_v19 = vld [vmem:[%s528_s5 + $0x8] sm:$0xff]  ;;  %v205_v21 = vld [vmem:[%s528_s5 + $0x10] sm:$0xff]  ;;  %v299_v37 = vshrl.u32 %v298_v35, 7  ;;  %s312_s28 = sshll.u32 %s420_s27, 4  ;;  %s313_s28 = int_to_ptr.vmem [resolvable:$true] %s312_s28 }
   0x6   :  { %v203_v18 = vld [vmem:[%s528_s5] sm:$0xff]  ;;  %v206_v22 = vld [vmem:[%s528_s5 + $0x18] sm:$0xff]  ;;  %s392_s29 = scalar_lea.vmem %s313_s28, 128  ;;  %p397_p1 = scmp.lt.s32.totalorder %s313_s28, %s313_s28 }
   0x7   :  { %346 = vmatmul.mubr.msk.f32.vlgmr.msra.gmra.mrb[0].mxu0 %vm37_vm1, %v27_v5  ;;  %375 = vmatpush3.bf16.msra.mxu1 %v374_v8  ;;  %v380_v20 = vpack.c.bf16 %v204_v19, %v203_v18  ;;  %v383_v23 = vpack.c.bf16 %v206_v22, %v205_v21  ;;  %v322_v24 = vld [vmem:[%s527_s4] ss:$0 sm:$0xff]  ;;  %v202_v36 = vld [vmem:[%s529_s6 + $0x2] sm:$0x1]  ;;  %v300_v38 = vsub.s32 0, %v299_v37  ;;  %p393_p0 = scmp.ne.s32.totalorder %s313_s28, %s392_s29  ;;  %p398_p2 = scmp.lt.s32.totalorder %s392_s29, %s392_s29 }
   0x8   :  { %367 = vmatprep.mubr.msk.f32.mxu0 %vm417_vm0, %v418_v4  ;;  %376 = vmatprep.subr.bf16.mxu1 %v416_v2  ;;  %v324_v30 = vld [vmem:[%s529_s6] ss:$0 sm:$0xff]  ;;  %vm284_vm3 = vcmp.gt.f32.partialorder %v202_v36, 0.5  ;;  %v327_v46 = vld [vmem:[%s529_s6 + $0x1] ss:$0 sm:$0xff] }
   0x9   :  { %381 = vmatpush3.bf16.msra.mxu0 %v380_v20  ;;  %v297_v41 = vsel %vm284_vm3, 1, %v419_v40  ;;  %p399_p3 = por %p398_p2, %p397_p1 }
   0xa   :  { %382 = vmatprep.subr.bf16.mxu0 %v416_v2  ;;  %v301_v44 = vrot.slane %v297_v41, %v300_v38 }
   0xb   :  { %378 = vmatpush3.bf16.msra.mxu1 %v377_v11  ;;  %p400_p4 = pnand %p399_p3, %p393_p0 }
   0xc   :  { %vm302_vm5 = vcmp.eq.s32.totalorder %v301_v44, 1 }
   0xd   :  { %384 = vmatpush3.bf16.msra.mxu0 %v383_v23 }
  0xda   :  { %v107_v13 = vpop.f32.mrb[0].mxu0 }
  0xdb   :  { %v108_v14 = vadd.f32 %v320_v12, %v107_v13  ;;  %v347_v15 = vpop.f32.mrb[1].mxu0 }
  0xdd   :  { %v111_v16 = vmax.f32 %v108_v14, 0.0 }
  0xdf   :  { %v112_v17 = vmin.f32 %v111_v16, 6.0 }
  0xe1   :  { %357 = vmatmul.mubr.msk.f32.vlgmr.msra.gmra.mrb[0].mxu1 %vm124_vm2, %v112_v17 }
 0x1b4   :  { %v194_v25 = vpop.f32.mrb[0].mxu1 }
 0x1b5   :  { %v195_v26 = vadd.f32 %v322_v24, %v194_v25  ;;  %v358_v27 = vpop.f32.mrb[1].mxu1 }
 0x1b7   :  { %v198_v28 = vmax.f32 %v195_v26, 0.0 }
 0x1b9   :  { %v199_v29 = vmin.f32 %v198_v28, 6.0 }
 0x1bb   :  { %368 = vmatmul.mubr.msk.f32.vlgmr.msra.gmra.mrb[2].mxu0 %vm124_vm2, %v199_v29 }
 0x28e   :  { %v280_v31 = vpop.f32.mrb[2].mxu0 }
 0x28f   :  { %v281_v32 = vadd.f32 %v324_v30, %v280_v31  ;;  %v369_v33 = vpop.f32.mrb[3].mxu0 }
 0x291   :  { %v286_v34 = vmul.f32 1.442695, %v281_v32  ;;  %vm285_vm4 = vcmp.gt.f32.partialorder %v281_v32, 0.0 }
 0x293   :  { %390 = vpow2.f32 %v286_v34 }
 0x29d   :  { %v391_v39 = vpop.eup %390 }
 0x29e   :  { %v326_v42 = vadd.f32 -1.0, %v391_v39 }
 0x2a0   :  { %v289_v43 = vmul.f32 1.6732632, %v326_v42 }
 0x2a2   :  { %v290_v45 = vsel %vm285_vm4, %v281_v32, %v289_v43 }
 0x2a3   :  { %v291_v47 = vmul.f32 1.050701, %v290_v45 }
 0x2a5   :  { %v296_v48 = vadd.f32 %v327_v46, %v291_v47 }
 0x2a7   :  { %v303_v49 = vsel %vm302_vm5, %v296_v48, %v281_v32 }
 0x2a8   :  { %305 = vst.msk [vmem:[#allocation2] sm:$0xff] %vm304_vm6, %v303_v49 }
 0x2a9   :  { %403 = shalt.err (!%p400_p4)
}
 0x2aa   :  { %s404_s6 = scalar_lea.hbm %s530_s7, 128 }
 0x2ab   :  { %p405_p5 = scmp.ne.s32.totalorder %s530_s7, %s404_s6  ;;  %p408_p6 = scmp.lt.u32.totalorder %s404_s6, %s530_s7 }
 0x2ad   :  { %p410_p7 = pnand %p408_p6, %p405_p5 }
 0x2af   :  { %413 = shalt.err (!%p410_p7)
}
 0x2b0   :  { %315 = dma.vmem_to_hbm [thread:$0]  %s313_s28, 128, %s530_s7, [#allocation3]  }
 0x2b1   :  { %414 = dma.done.wait [#allocation3], 128  }
 0x2b2   :  { %415 = vsyncadd [#allocation3], 4294967168 }
 0x2b3   :  { %319 = vsyncpa [#allocation3], 1 }

</bundles_post_ra>
